<compile_context>
chip_gen: v6e
topology: v6e:2x2x1
jax: 0.10.0
libtpu: 0.0.40
codegen_flags: <defaults>
</compile_context>

<pallas_src>
import functools

import jax
import jax.numpy as jnp
from jax import lax
from jax.experimental import pallas as pl
from jax.experimental.pallas import tpu as pltpu


def _log_sigmoid(x):
    # numerically stable: logsigmoid(x) = min(x, 0) - log1p(exp(-|x|))
    return jnp.minimum(x, 0.0) - jnp.log1p(jnp.exp(-jnp.abs(x)))


def _round_up(x, m):
    return ((x + m - 1) // m) * m


def skipgram_kernel(
    # scalar prefetch (SMEM)
    u_idx_ref,     # (padded_batch,)           int32 : pos_u indices
    ctx_idx_ref,   # (num_ctx*padded_batch,)   int32 : [pos_v ; neg_v.T], ctx-major
    # inputs (VMEM-resident, full-array blocks)
    u_tab_ref,     # (V_pad, Dp) f32 : U embedding table
    v_tab_ref,     # (V_pad, Dp) f32 : V embedding table
    # output
    loss_ref,      # (1, 1, tile_b) f32 : per-row loss contributions of this tile
    # scratch
    u_buf,         # (tile_b, Dp)          f32 VMEM
    c_buf,         # (num_ctx, tile_b, Dp) f32 VMEM
    *,
    tile_b, num_ctx, padded_batch,
):
    t = pl.program_id(0)
    row0 = t * tile_b

    # ---- gather: dynamic vector loads from the VMEM-resident tables --------
    # Statically unrolled: scratch stores use static row offsets; only the
    # table reads carry a dynamic (data-dependent) sublane offset.
    for i in range(tile_b):
        g = row0 + i
        u_buf[pl.ds(i, 1), :] = u_tab_ref[pl.ds(u_idx_ref[g], 1), :]
        for j in range(num_ctx):                   # slot 0 = positive context
            c_buf[j, pl.ds(i, 1), :] = (
                v_tab_ref[pl.ds(ctx_idx_ref[j * padded_batch + g], 1), :])

    # ---- compute: dense lane-wide f32 tiles ---------------------------------
    u = u_buf[...]                                       # (tile_b, Dp)
    c = c_buf[...]                                       # (num_ctx, tile_b, Dp)
    scores = jnp.sum(c * u[None, :, :], axis=-1)         # (num_ctx, tile_b)

    # slot 0 (positive pair) keeps +score, negatives use -score; one
    # logsigmoid pass over the stacked scores.
    slot = lax.broadcasted_iota(jnp.int32, scores.shape, 0)
    ls = _log_sigmoid(jnp.where(slot == 0, scores, -scores))

    # per-row (un-negated) loss contribution for this tile
    loss_ref[0, :, :] = jnp.sum(ls, axis=0, keepdims=True)   # (1, tile_b)


def skipgram_loss(u_weight, v_weight, pos_u, pos_v, neg_v, *, tile_b=None):
    """Forward loss of SkipGram with a VMEM-resident-table fused gather."""
    vocab, embed_dim = u_weight.shape
    batch = pos_u.shape[0]
    num_neg = neg_v.shape[1]
    num_ctx = num_neg + 1                      # positive context + K negatives

    d_pad = _round_up(embed_dim, 128)          # lane-dense feature dim
    v_pad = _round_up(vocab, 8)                # sublane-aligned vocab dim

    # Zero-pad: padded features contribute 0 to every dot product; padded
    # vocab rows are never indexed.
    def pad_table(w):
        return jnp.pad(w.astype(jnp.float32),
                       ((0, v_pad - vocab), (0, d_pad - embed_dim)))

    u_tab = pad_table(u_weight)
    v_tab = pad_table(v_weight)

    # Batch tile: multiple of 8; keep the unrolled gather loop modest and
    # prefer >=2 tiles so the "parallel" grid axis can feed both v7x cores.
    if tile_b is None:
        tile_b = min(128, _round_up(batch, 8))
        if batch >= 16:
            tile_b = min(tile_b, _round_up((batch + 1) // 2, 8))
    tile_b = max(8, _round_up(tile_b, 8))
    num_tiles = (batch + tile_b - 1) // tile_b
    padded_batch = num_tiles * tile_b

    # Index tables for scalar prefetch (padded rows index row 0; their loss
    # contributions are dropped by the final slice below).
    # TODO(synk): for very large batches stream per-tile index blocks instead
    # of scalar-prefetching the whole index table into SMEM.
    pos_u_p = jnp.pad(pos_u.astype(jnp.int32), (0, padded_batch - batch))
    pos_v_p = jnp.pad(pos_v.astype(jnp.int32), (0, padded_batch - batch))
    neg_v_p = jnp.pad(neg_v.astype(jnp.int32),
                      ((0, padded_batch - batch), (0, 0)))
    ctx_idx = jnp.concatenate([pos_v_p[None, :], neg_v_p.T], axis=0).reshape(-1)

    # VMEM budget: tables (assume pipeline double-buffers each once) + scratch.
    table_bytes = 2 * v_pad * d_pad * 4
    scratch_bytes = (num_ctx + 1) * tile_b * d_pad * 4
    vmem_needed = 2 * table_bytes + scratch_bytes + 8 * tile_b * 4
    if vmem_needed > (40 << 20):   # conservative vs. v7x's 64 MiB per core
        # TODO(synk): fall back to an HBM-gather kernel (manual DMA with
        # consolidated waits + cross-tile double buffering) for huge vocabs.
        raise NotImplementedError(
            "embedding tables too large for the VMEM-resident gather path")

    kernel = functools.partial(
        skipgram_kernel,
        tile_b=tile_b, num_ctx=num_ctx, padded_batch=padded_batch)

    grid_spec = pltpu.PrefetchScalarGridSpec(
        num_scalar_prefetch=2,
        grid=(num_tiles,),
        in_specs=[
            # Full-array blocks with a constant index_map: fetched once, then
            # resident in VMEM for every grid step.
            pl.BlockSpec((v_pad, d_pad), lambda t, u_idx, ctx: (0, 0)),
            pl.BlockSpec((v_pad, d_pad), lambda t, u_idx, ctx: (0, 0)),
        ],
        out_specs=pl.BlockSpec((1, 1, tile_b), lambda t, u_idx, ctx: (t, 0, 0)),
        scratch_shapes=[
            pltpu.VMEM((tile_b, d_pad), jnp.float32),
            pltpu.VMEM((num_ctx, tile_b, d_pad), jnp.float32),
        ],
    )

    partials = pl.pallas_call(
        kernel,
        out_shape=jax.ShapeDtypeStruct((num_tiles, 1, tile_b), jnp.float32),
        grid_spec=grid_spec,
        compiler_params=pltpu.CompilerParams(
            dimension_semantics=("parallel",),
            vmem_limit_bytes=int(min(48 << 20, max(16 << 20, 2 * vmem_needed))),
        ),
    )(pos_u_p, ctx_idx, u_tab, v_tab)

    # per-row loss contributions, padded rows sliced away, then negate+sum.
    per_row = partials.reshape(padded_batch)[:batch]
    return -jnp.sum(per_row)


def reference_loss(u_weight, v_weight, pos_u, pos_v, neg_v):
    emb_u = u_weight[pos_u]
    emb_v = v_weight[pos_v]
    pos_ls = jax.nn.log_sigmoid(jnp.sum(emb_u * emb_v, axis=1))
    neg_emb_v = v_weight[neg_v]
    neg_score = jnp.einsum("bkd,bd->bk", neg_emb_v, emb_u)
    neg_ls = jax.nn.log_sigmoid(-neg_score)
    return -(jnp.sum(pos_ls) + jnp.sum(neg_ls))


if __name__ == "__main__":
    # Small deterministic setup consistent with SkipGram(input_size, embed_dim).
    vocab = 64          # input_size
    embed_dim = 32      # embed_dim
    B = 8               # batch of (center, context) pairs
    K = 4               # negative samples per pair

    key = jax.random.PRNGKey(0)
    ku, kv, kpu, kpv, knv = jax.random.split(key, 5)

    # u ~ Uniform(-0.5/embed_dim, 0.5/embed_dim) as in init_embeddings();
    # v gets the same small random init (the module's all-zero v init would
    # make the numerical check trivial).
    u_weight = jax.random.uniform(
        ku, (vocab, embed_dim), dtype=jnp.float32,
        minval=-0.5 / embed_dim, maxval=0.5 / embed_dim)
    v_weight = jax.random.uniform(
        kv, (vocab, embed_dim), dtype=jnp.float32,
        minval=-0.5 / embed_dim, maxval=0.5 / embed_dim)

    pos_u = jax.random.randint(kpu, (B,), 0, vocab, dtype=jnp.int32)
    pos_v = jax.random.randint(kpv, (B,), 0, vocab, dtype=jnp.int32)
    neg_v = jax.random.randint(knv, (B, K), 0, vocab, dtype=jnp.int32)

    loss = jax.jit(skipgram_loss)(u_weight, v_weight, pos_u, pos_v, neg_v)
    jax.block_until_ready(loss)

    # Tables stay f32 end-to-end now, so compare directly against the
    # unquantized reference.
    ref = reference_loss(u_weight, v_weight, pos_u, pos_v, neg_v)
    assert jnp.allclose(loss, ref, rtol=1e-5, atol=1e-5), (loss, ref)

    print("KERNEL_OK")
</pallas_src>

<mosaic_0001>
module attributes {stable_mosaic.version = 11 : i64} {
  func.func @skipgram_kernel(%arg0: i32, %arg1: memref<8xi32, #tpu.memory_space<smem>>, %arg2: memref<40xi32, #tpu.memory_space<smem>>, %arg3: memref<64x128xf32, #tpu.memory_space<vmem>>, %arg4: memref<64x128xf32, #tpu.memory_space<vmem>>, %arg5: memref<1x1x8xf32, #tpu.memory_space<vmem>>, %arg6: memref<8x128xf32, #tpu.memory_space<vmem>>, %arg7: memref<5x8x128xf32, #tpu.memory_space<vmem>>) attributes {dimension_semantics = [#tpu.dimension_semantics<parallel>], iteration_bounds = array<i64: 1>, scalar_prefetch = 2 : i64, scratch_operands = 2 : i64, tpu.core_type = #tpu.core_type<tc>, window_params = [{pipeline_mode = #tpu.pipeline_mode<synchronous>, transform_indices = @transform_0, window_bounds = array<i64: 64, 128>}, {pipeline_mode = #tpu.pipeline_mode<synchronous>, transform_indices = @transform_1, window_bounds = array<i64: 64, 128>}, {transform_indices = @transform_2, window_bounds = array<i64: 1, 1, 8>}]} {
    %c8_i32 = arith.constant 8 : i32
    %0 = arith.muli %arg0, %c8_i32 : i32
    %c0_i32 = arith.constant 0 : i32
    %1 = arith.addi %0, %c0_i32 : i32
    %2 = arith.index_cast %1 : i32 to index
    %3 = memref.load %arg1[%2] : memref<8xi32, #tpu.memory_space<smem>>
    %4 = arith.index_cast %3 : i32 to index
    %c0 = arith.constant 0 : index
    %5 = vector.load %arg3[%4, %c0] : memref<64x128xf32, #tpu.memory_space<vmem>>, vector<1x128xf32>
    %c0_0 = arith.constant 0 : index
    %c0_1 = arith.constant 0 : index
    %6 = vector.load %arg6[%c0_0, %c0_1] : memref<8x128xf32, #tpu.memory_space<vmem>>, vector<1x128xf32>
    tpu.vector_store %arg6[%c0_0, %c0_1], %5 {strides = array<i32>} : memref<8x128xf32, #tpu.memory_space<vmem>>, vector<1x128xf32>,
    %c0_i32_2 = arith.constant 0 : i32
    %7 = arith.addi %c0_i32_2, %1 : i32
    %8 = arith.index_cast %7 : i32 to index
    %9 = memref.load %arg2[%8] : memref<40xi32, #tpu.memory_space<smem>>
    %10 = arith.index_cast %9 : i32 to index
    %c0_3 = arith.constant 0 : index
    %11 = vector.load %arg4[%10, %c0_3] : memref<64x128xf32, #tpu.memory_space<vmem>>, vector<1x128xf32>
    %c0_4 = arith.constant 0 : index
    %c0_5 = arith.constant 0 : index
    %c0_6 = arith.constant 0 : index
    %12 = vector.load %arg7[%c0_4, %c0_5, %c0_6] : memref<5x8x128xf32, #tpu.memory_space<vmem>>, vector<1x1x128xf32>
    %13 = vector.shape_cast %12 : vector<1x1x128xf32> to vector<1x128xf32>
    %14 = vector.shape_cast %11 : vector<1x128xf32> to vector<1x1x128xf32>
    tpu.vector_store %arg7[%c0_4, %c0_5, %c0_6], %14 {strides = array<i32>} : memref<5x8x128xf32, #tpu.memory_space<vmem>>, vector<1x1x128xf32>,
    %c8_i32_7 = arith.constant 8 : i32
    %15 = arith.addi %c8_i32_7, %1 : i32
    %16 = arith.index_cast %15 : i32 to index
    %17 = memref.load %arg2[%16] : memref<40xi32, #tpu.memory_space<smem>>
    %18 = arith.index_cast %17 : i32 to index
    %c0_8 = arith.constant 0 : index
    %19 = vector.load %arg4[%18, %c0_8] : memref<64x128xf32, #tpu.memory_space<vmem>>, vector<1x128xf32>
    %c1 = arith.constant 1 : index
    %c0_9 = arith.constant 0 : index
    %c0_10 = arith.constant 0 : index
    %20 = vector.load %arg7[%c1, %c0_9, %c0_10] : memref<5x8x128xf32, #tpu.memory_space<vmem>>, vector<1x1x128xf32>
    %21 = vector.shape_cast %20 : vector<1x1x128xf32> to vector<1x128xf32>
    %22 = vector.shape_cast %19 : vector<1x128xf32> to vector<1x1x128xf32>
    tpu.vector_store %arg7[%c1, %c0_9, %c0_10], %22 {strides = array<i32>} : memref<5x8x128xf32, #tpu.memory_space<vmem>>, vector<1x1x128xf32>,
    %c16_i32 = arith.constant 16 : i32
    %23 = arith.addi %c16_i32, %1 : i32
    %24 = arith.index_cast %23 : i32 to index
    %25 = memref.load %arg2[%24] : memref<40xi32, #tpu.memory_space<smem>>
    %26 = arith.index_cast %25 : i32 to index
    %c0_11 = arith.constant 0 : index
    %27 = vector.load %arg4[%26, %c0_11] : memref<64x128xf32, #tpu.memory_space<vmem>>, vector<1x128xf32>
    %c2 = arith.constant 2 : index
    %c0_12 = arith.constant 0 : index
    %c0_13 = arith.constant 0 : index
    %28 = vector.load %arg7[%c2, %c0_12, %c0_13] : memref<5x8x128xf32, #tpu.memory_space<vmem>>, vector<1x1x128xf32>
    %29 = vector.shape_cast %28 : vector<1x1x128xf32> to vector<1x128xf32>
    %30 = vector.shape_cast %27 : vector<1x128xf32> to vector<1x1x128xf32>
    tpu.vector_store %arg7[%c2, %c0_12, %c0_13], %30 {strides = array<i32>} : memref<5x8x128xf32, #tpu.memory_space<vmem>>, vector<1x1x128xf32>,
    %c24_i32 = arith.constant 24 : i32
    %31 = arith.addi %c24_i32, %1 : i32
    %32 = arith.index_cast %31 : i32 to index
    %33 = memref.load %arg2[%32] : memref<40xi32, #tpu.memory_space<smem>>
    %34 = arith.index_cast %33 : i32 to index
    %c0_14 = arith.constant 0 : index
    %35 = vector.load %arg4[%34, %c0_14] : memref<64x128xf32, #tpu.memory_space<vmem>>, vector<1x128xf32>
    %c3 = arith.constant 3 : index
    %c0_15 = arith.constant 0 : index
    %c0_16 = arith.constant 0 : index
    %36 = vector.load %arg7[%c3, %c0_15, %c0_16] : memref<5x8x128xf32, #tpu.memory_space<vmem>>, vector<1x1x128xf32>
    %37 = vector.shape_cast %36 : vector<1x1x128xf32> to vector<1x128xf32>
    %38 = vector.shape_cast %35 : vector<1x128xf32> to vector<1x1x128xf32>
    tpu.vector_store %arg7[%c3, %c0_15, %c0_16], %38 {strides = array<i32>} : memref<5x8x128xf32, #tpu.memory_space<vmem>>, vector<1x1x128xf32>,
    %c32_i32 = arith.constant 32 : i32
    %39 = arith.addi %c32_i32, %1 : i32
    %40 = arith.index_cast %39 : i32 to index
    %41 = memref.load %arg2[%40] : memref<40xi32, #tpu.memory_space<smem>>
    %42 = arith.index_cast %41 : i32 to index
    %c0_17 = arith.constant 0 : index
    %43 = vector.load %arg4[%42, %c0_17] : memref<64x128xf32, #tpu.memory_space<vmem>>, vector<1x128xf32>
    %c4 = arith.constant 4 : index
    %c0_18 = arith.constant 0 : index
    %c0_19 = arith.constant 0 : index
    %44 = vector.load %arg7[%c4, %c0_18, %c0_19] : memref<5x8x128xf32, #tpu.memory_space<vmem>>, vector<1x1x128xf32>
    %45 = vector.shape_cast %44 : vector<1x1x128xf32> to vector<1x128xf32>
    %46 = vector.shape_cast %43 : vector<1x128xf32> to vector<1x1x128xf32>
    tpu.vector_store %arg7[%c4, %c0_18, %c0_19], %46 {strides = array<i32>} : memref<5x8x128xf32, #tpu.memory_space<vmem>>, vector<1x1x128xf32>,
    %c1_i32 = arith.constant 1 : i32
    %47 = arith.addi %0, %c1_i32 : i32
    %48 = arith.index_cast %47 : i32 to index
    %49 = memref.load %arg1[%48] : memref<8xi32, #tpu.memory_space<smem>>
    %50 = arith.index_cast %49 : i32 to index
    %c0_20 = arith.constant 0 : index
    %51 = vector.load %arg3[%50, %c0_20] : memref<64x128xf32, #tpu.memory_space<vmem>>, vector<1x128xf32>
    %c1_21 = arith.constant 1 : index
    %c0_22 = arith.constant 0 : index
    %52 = vector.load %arg6[%c1_21, %c0_22] : memref<8x128xf32, #tpu.memory_space<vmem>>, vector<1x128xf32>
    tpu.vector_store %arg6[%c1_21, %c0_22], %51 {strides = array<i32>} : memref<8x128xf32, #tpu.memory_space<vmem>>, vector<1x128xf32>,
    %c0_i32_23 = arith.constant 0 : i32
    %53 = arith.addi %c0_i32_23, %47 : i32
    %54 = arith.index_cast %53 : i32 to index
    %55 = memref.load %arg2[%54] : memref<40xi32, #tpu.memory_space<smem>>
    %56 = arith.index_cast %55 : i32 to index
    %c0_24 = arith.constant 0 : index
    %57 = vector.load %arg4[%56, %c0_24] : memref<64x128xf32, #tpu.memory_space<vmem>>, vector<1x128xf32>
    %c0_25 = arith.constant 0 : index
    %c1_26 = arith.constant 1 : index
    %c0_27 = arith.constant 0 : index
    %58 = vector.load %arg7[%c0_25, %c1_26, %c0_27] : memref<5x8x128xf32, #tpu.memory_space<vmem>>, vector<1x1x128xf32>
    %59 = vector.shape_cast %58 : vector<1x1x128xf32> to vector<1x128xf32>
    %60 = vector.shape_cast %57 : vector<1x128xf32> to vector<1x1x128xf32>
    tpu.vector_store %arg7[%c0_25, %c1_26, %c0_27], %60 {strides = array<i32>} : memref<5x8x128xf32, #tpu.memory_space<vmem>>, vector<1x1x128xf32>,
    %c8_i32_28 = arith.constant 8 : i32
    %61 = arith.addi %c8_i32_28, %47 : i32
    %62 = arith.index_cast %61 : i32 to index
    %63 = memref.load %arg2[%62] : memref<40xi32, #tpu.memory_space<smem>>
    %64 = arith.index_cast %63 : i32 to index
    %c0_29 = arith.constant 0 : index
    %65 = vector.load %arg4[%64, %c0_29] : memref<64x128xf32, #tpu.memory_space<vmem>>, vector<1x128xf32>
    %c1_30 = arith.constant 1 : index
    %c1_31 = arith.constant 1 : index
    %c0_32 = arith.constant 0 : index
    %66 = vector.load %arg7[%c1_30, %c1_31, %c0_32] : memref<5x8x128xf32, #tpu.memory_space<vmem>>, vector<1x1x128xf32>
    %67 = vector.shape_cast %66 : vector<1x1x128xf32> to vector<1x128xf32>
    %68 = vector.shape_cast %65 : vector<1x128xf32> to vector<1x1x128xf32>
    tpu.vector_store %arg7[%c1_30, %c1_31, %c0_32], %68 {strides = array<i32>} : memref<5x8x128xf32, #tpu.memory_space<vmem>>, vector<1x1x128xf32>,
    %c16_i32_33 = arith.constant 16 : i32
    %69 = arith.addi %c16_i32_33, %47 : i32
    %70 = arith.index_cast %69 : i32 to index
    %71 = memref.load %arg2[%70] : memref<40xi32, #tpu.memory_space<smem>>
    %72 = arith.index_cast %71 : i32 to index
    %c0_34 = arith.constant 0 : index
    %73 = vector.load %arg4[%72, %c0_34] : memref<64x128xf32, #tpu.memory_space<vmem>>, vector<1x128xf32>
    %c2_35 = arith.constant 2 : index
    %c1_36 = arith.constant 1 : index
    %c0_37 = arith.constant 0 : index
    %74 = vector.load %arg7[%c2_35, %c1_36, %c0_37] : memref<5x8x128xf32, #tpu.memory_space<vmem>>, vector<1x1x128xf32>
    %75 = vector.shape_cast %74 : vector<1x1x128xf32> to vector<1x128xf32>
    %76 = vector.shape_cast %73 : vector<1x128xf32> to vector<1x1x128xf32>
    tpu.vector_store %arg7[%c2_35, %c1_36, %c0_37], %76 {strides = array<i32>} : memref<5x8x128xf32, #tpu.memory_space<vmem>>, vector<1x1x128xf32>,
    %c24_i32_38 = arith.constant 24 : i32
    %77 = arith.addi %c24_i32_38, %47 : i32
    %78 = arith.index_cast %77 : i32 to index
    %79 = memref.load %arg2[%78] : memref<40xi32, #tpu.memory_space<smem>>
    %80 = arith.index_cast %79 : i32 to index
    %c0_39 = arith.constant 0 : index
    %81 = vector.load %arg4[%80, %c0_39] : memref<64x128xf32, #tpu.memory_space<vmem>>, vector<1x128xf32>
    %c3_40 = arith.constant 3 : index
    %c1_41 = arith.constant 1 : index
    %c0_42 = arith.constant 0 : index
    %82 = vector.load %arg7[%c3_40, %c1_41, %c0_42] : memref<5x8x128xf32, #tpu.memory_space<vmem>>, vector<1x1x128xf32>
    %83 = vector.shape_cast %82 : vector<1x1x128xf32> to vector<1x128xf32>
    %84 = vector.shape_cast %81 : vector<1x128xf32> to vector<1x1x128xf32>
    tpu.vector_store %arg7[%c3_40, %c1_41, %c0_42], %84 {strides = array<i32>} : memref<5x8x128xf32, #tpu.memory_space<vmem>>, vector<1x1x128xf32>,
    %c32_i32_43 = arith.constant 32 : i32
    %85 = arith.addi %c32_i32_43, %47 : i32
    %86 = arith.index_cast %85 : i32 to index
    %87 = memref.load %arg2[%86] : memref<40xi32, #tpu.memory_space<smem>>
    %88 = arith.index_cast %87 : i32 to index
    %c0_44 = arith.constant 0 : index
    %89 = vector.load %arg4[%88, %c0_44] : memref<64x128xf32, #tpu.memory_space<vmem>>, vector<1x128xf32>
    %c4_45 = arith.constant 4 : index
    %c1_46 = arith.constant 1 : index
    %c0_47 = arith.constant 0 : index
    %90 = vector.load %arg7[%c4_45, %c1_46, %c0_47] : memref<5x8x128xf32, #tpu.memory_space<vmem>>, vector<1x1x128xf32>
    %91 = vector.shape_cast %90 : vector<1x1x128xf32> to vector<1x128xf32>
    %92 = vector.shape_cast %89 : vector<1x128xf32> to vector<1x1x128xf32>
    tpu.vector_store %arg7[%c4_45, %c1_46, %c0_47], %92 {strides = array<i32>} : memref<5x8x128xf32, #tpu.memory_space<vmem>>, vector<1x1x128xf32>,
    %c2_i32 = arith.constant 2 : i32
    %93 = arith.addi %0, %c2_i32 : i32
    %94 = arith.index_cast %93 : i32 to index
    %95 = memref.load %arg1[%94] : memref<8xi32, #tpu.memory_space<smem>>
    %96 = arith.index_cast %95 : i32 to index
    %c0_48 = arith.constant 0 : index
    %97 = vector.load %arg3[%96, %c0_48] : memref<64x128xf32, #tpu.memory_space<vmem>>, vector<1x128xf32>
    %c2_49 = arith.constant 2 : index
    %c0_50 = arith.constant 0 : index
    %98 = vector.load %arg6[%c2_49, %c0_50] : memref<8x128xf32, #tpu.memory_space<vmem>>, vector<1x128xf32>
    tpu.vector_store %arg6[%c2_49, %c0_50], %97 {strides = array<i32>} : memref<8x128xf32, #tpu.memory_space<vmem>>, vector<1x128xf32>,
    %c0_i32_51 = arith.constant 0 : i32
    %99 = arith.addi %c0_i32_51, %93 : i32
    %100 = arith.index_cast %99 : i32 to index
    %101 = memref.load %arg2[%100] : memref<40xi32, #tpu.memory_space<smem>>
    %102 = arith.index_cast %101 : i32 to index
    %c0_52 = arith.constant 0 : index
    %103 = vector.load %arg4[%102, %c0_52] : memref<64x128xf32, #tpu.memory_space<vmem>>, vector<1x128xf32>
    %c0_53 = arith.constant 0 : index
    %c2_54 = arith.constant 2 : index
    %c0_55 = arith.constant 0 : index
    %104 = vector.load %arg7[%c0_53, %c2_54, %c0_55] : memref<5x8x128xf32, #tpu.memory_space<vmem>>, vector<1x1x128xf32>
    %105 = vector.shape_cast %104 : vector<1x1x128xf32> to vector<1x128xf32>
    %106 = vector.shape_cast %103 : vector<1x128xf32> to vector<1x1x128xf32>
    tpu.vector_store %arg7[%c0_53, %c2_54, %c0_55], %106 {strides = array<i32>} : memref<5x8x128xf32, #tpu.memory_space<vmem>>, vector<1x1x128xf32>,
    %c8_i32_56 = arith.constant 8 : i32
    %107 = arith.addi %c8_i32_56, %93 : i32
    %108 = arith.index_cast %107 : i32 to index
    %109 = memref.load %arg2[%108] : memref<40xi32, #tpu.memory_space<smem>>
    %110 = arith.index_cast %109 : i32 to index
    %c0_57 = arith.constant 0 : index
    %111 = vector.load %arg4[%110, %c0_57] : memref<64x128xf32, #tpu.memory_space<vmem>>, vector<1x128xf32>
    %c1_58 = arith.constant 1 : index
    %c2_59 = arith.constant 2 : index
    %c0_60 = arith.constant 0 : index
    %112 = vector.load %arg7[%c1_58, %c2_59, %c0_60] : memref<5x8x128xf32, #tpu.memory_space<vmem>>, vector<1x1x128xf32>
    %113 = vector.shape_cast %112 : vector<1x1x128xf32> to vector<1x128xf32>
    %114 = vector.shape_cast %111 : vector<1x128xf32> to vector<1x1x128xf32>
    tpu.vector_store %arg7[%c1_58, %c2_59, %c0_60], %114 {strides = array<i32>} : memref<5x8x128xf32, #tpu.memory_space<vmem>>, vector<1x1x128xf32>,
    %c16_i32_61 = arith.constant 16 : i32
    %115 = arith.addi %c16_i32_61, %93 : i32
    %116 = arith.index_cast %115 : i32 to index
    %117 = memref.load %arg2[%116] : memref<40xi32, #tpu.memory_space<smem>>
    %118 = arith.index_cast %117 : i32 to index
    %c0_62 = arith.constant 0 : index
    %119 = vector.load %arg4[%118, %c0_62] : memref<64x128xf32, #tpu.memory_space<vmem>>, vector<1x128xf32>
    %c2_63 = arith.constant 2 : index
    %c2_64 = arith.constant 2 : index
    %c0_65 = arith.constant 0 : index
    %120 = vector.load %arg7[%c2_63, %c2_64, %c0_65] : memref<5x8x128xf32, #tpu.memory_space<vmem>>, vector<1x1x128xf32>
    %121 = vector.shape_cast %120 : vector<1x1x128xf32> to vector<1x128xf32>
    %122 = vector.shape_cast %119 : vector<1x128xf32> to vector<1x1x128xf32>
    tpu.vector_store %arg7[%c2_63, %c2_64, %c0_65], %122 {strides = array<i32>} : memref<5x8x128xf32, #tpu.memory_space<vmem>>, vector<1x1x128xf32>,
    %c24_i32_66 = arith.constant 24 : i32
    %123 = arith.addi %c24_i32_66, %93 : i32
    %124 = arith.index_cast %123 : i32 to index
    %125 = memref.load %arg2[%124] : memref<40xi32, #tpu.memory_space<smem>>
    %126 = arith.index_cast %125 : i32 to index
    %c0_67 = arith.constant 0 : index
    %127 = vector.load %arg4[%126, %c0_67] : memref<64x128xf32, #tpu.memory_space<vmem>>, vector<1x128xf32>
    %c3_68 = arith.constant 3 : index
    %c2_69 = arith.constant 2 : index
    %c0_70 = arith.constant 0 : index
    %128 = vector.load %arg7[%c3_68, %c2_69, %c0_70] : memref<5x8x128xf32, #tpu.memory_space<vmem>>, vector<1x1x128xf32>
    %129 = vector.shape_cast %128 : vector<1x1x128xf32> to vector<1x128xf32>
    %130 = vector.shape_cast %127 : vector<1x128xf32> to vector<1x1x128xf32>
    tpu.vector_store %arg7[%c3_68, %c2_69, %c0_70], %130 {strides = array<i32>} : memref<5x8x128xf32, #tpu.memory_space<vmem>>, vector<1x1x128xf32>,
    %c32_i32_71 = arith.constant 32 : i32
    %131 = arith.addi %c32_i32_71, %93 : i32
    %132 = arith.index_cast %131 : i32 to index
    %133 = memref.load %arg2[%132] : memref<40xi32, #tpu.memory_space<smem>>
    %134 = arith.index_cast %133 : i32 to index
    %c0_72 = arith.constant 0 : index
    %135 = vector.load %arg4[%134, %c0_72] : memref<64x128xf32, #tpu.memory_space<vmem>>, vector<1x128xf32>
    %c4_73 = arith.constant 4 : index
    %c2_74 = arith.constant 2 : index
    %c0_75 = arith.constant 0 : index
    %136 = vector.load %arg7[%c4_73, %c2_74, %c0_75] : memref<5x8x128xf32, #tpu.memory_space<vmem>>, vector<1x1x128xf32>
    %137 = vector.shape_cast %136 : vector<1x1x128xf32> to vector<1x128xf32>
    %138 = vector.shape_cast %135 : vector<1x128xf32> to vector<1x1x128xf32>
    tpu.vector_store %arg7[%c4_73, %c2_74, %c0_75], %138 {strides = array<i32>} : memref<5x8x128xf32, #tpu.memory_space<vmem>>, vector<1x1x128xf32>,
    %c3_i32 = arith.constant 3 : i32
    %139 = arith.addi %0, %c3_i32 : i32
    %140 = arith.index_cast %139 : i32 to index
    %141 = memref.load %arg1[%140] : memref<8xi32, #tpu.memory_space<smem>>
    %142 = arith.index_cast %141 : i32 to index
    %c0_76 = arith.constant 0 : index
    %143 = vector.load %arg3[%142, %c0_76] : memref<64x128xf32, #tpu.memory_space<vmem>>, vector<1x128xf32>
    %c3_77 = arith.constant 3 : index
    %c0_78 = arith.constant 0 : index
    %144 = vector.load %arg6[%c3_77, %c0_78] : memref<8x128xf32, #tpu.memory_space<vmem>>, vector<1x128xf32>
    tpu.vector_store %arg6[%c3_77, %c0_78], %143 {strides = array<i32>} : memref<8x128xf32, #tpu.memory_space<vmem>>, vector<1x128xf32>,
    %c0_i32_79 = arith.constant 0 : i32
    %145 = arith.addi %c0_i32_79, %139 : i32
    %146 = arith.index_cast %145 : i32 to index
    %147 = memref.load %arg2[%146] : memref<40xi32, #tpu.memory_space<smem>>
    %148 = arith.index_cast %147 : i32 to index
    %c0_80 = arith.constant 0 : index
    %149 = vector.load %arg4[%148, %c0_80] : memref<64x128xf32, #tpu.memory_space<vmem>>, vector<1x128xf32>
    %c0_81 = arith.constant 0 : index
    %c3_82 = arith.constant 3 : index
    %c0_83 = arith.constant 0 : index
    %150 = vector.load %arg7[%c0_81, %c3_82, %c0_83] : memref<5x8x128xf32, #tpu.memory_space<vmem>>, vector<1x1x128xf32>
    %151 = vector.shape_cast %150 : vector<1x1x128xf32> to vector<1x128xf32>
    %152 = vector.shape_cast %149 : vector<1x128xf32> to vector<1x1x128xf32>
    tpu.vector_store %arg7[%c0_81, %c3_82, %c0_83], %152 {strides = array<i32>} : memref<5x8x128xf32, #tpu.memory_space<vmem>>, vector<1x1x128xf32>,
    %c8_i32_84 = arith.constant 8 : i32
    %153 = arith.addi %c8_i32_84, %139 : i32
    %154 = arith.index_cast %153 : i32 to index
    %155 = memref.load %arg2[%154] : memref<40xi32, #tpu.memory_space<smem>>
    %156 = arith.index_cast %155 : i32 to index
    %c0_85 = arith.constant 0 : index
    %157 = vector.load %arg4[%156, %c0_85] : memref<64x128xf32, #tpu.memory_space<vmem>>, vector<1x128xf32>
    %c1_86 = arith.constant 1 : index
    %c3_87 = arith.constant 3 : index
    %c0_88 = arith.constant 0 : index
    %158 = vector.load %arg7[%c1_86, %c3_87, %c0_88] : memref<5x8x128xf32, #tpu.memory_space<vmem>>, vector<1x1x128xf32>
    %159 = vector.shape_cast %158 : vector<1x1x128xf32> to vector<1x128xf32>
    %160 = vector.shape_cast %157 : vector<1x128xf32> to vector<1x1x128xf32>
    tpu.vector_store %arg7[%c1_86, %c3_87, %c0_88], %160 {strides = array<i32>} : memref<5x8x128xf32, #tpu.memory_space<vmem>>, vector<1x1x128xf32>,
    %c16_i32_89 = arith.constant 16 : i32
    %161 = arith.addi %c16_i32_89, %139 : i32
    %162 = arith.index_cast %161 : i32 to index
    %163 = memref.load %arg2[%162] : memref<40xi32, #tpu.memory_space<smem>>
    %164 = arith.index_cast %163 : i32 to index
    %c0_90 = arith.constant 0 : index
    %165 = vector.load %arg4[%164, %c0_90] : memref<64x128xf32, #tpu.memory_space<vmem>>, vector<1x128xf32>
    %c2_91 = arith.constant 2 : index
    %c3_92 = arith.constant 3 : index
    %c0_93 = arith.constant 0 : index
    %166 = vector.load %arg7[%c2_91, %c3_92, %c0_93] : memref<5x8x128xf32, #tpu.memory_space<vmem>>, vector<1x1x128xf32>
    %167 = vector.shape_cast %166 : vector<1x1x128xf32> to vector<1x128xf32>
    %168 = vector.shape_cast %165 : vector<1x128xf32> to vector<1x1x128xf32>
    tpu.vector_store %arg7[%c2_91, %c3_92, %c0_93], %168 {strides = array<i32>} : memref<5x8x128xf32, #tpu.memory_space<vmem>>, vector<1x1x128xf32>,
    %c24_i32_94 = arith.constant 24 : i32
    %169 = arith.addi %c24_i32_94, %139 : i32
    %170 = arith.index_cast %169 : i32 to index
    %171 = memref.load %arg2[%170] : memref<40xi32, #tpu.memory_space<smem>>
    %172 = arith.index_cast %171 : i32 to index
    %c0_95 = arith.constant 0 : index
    %173 = vector.load %arg4[%172, %c0_95] : memref<64x128xf32, #tpu.memory_space<vmem>>, vector<1x128xf32>
    %c3_96 = arith.constant 3 : index
    %c3_97 = arith.constant 3 : index
    %c0_98 = arith.constant 0 : index
    %174 = vector.load %arg7[%c3_96, %c3_97, %c0_98] : memref<5x8x128xf32, #tpu.memory_space<vmem>>, vector<1x1x128xf32>
    %175 = vector.shape_cast %174 : vector<1x1x128xf32> to vector<1x128xf32>
    %176 = vector.shape_cast %173 : vector<1x128xf32> to vector<1x1x128xf32>
    tpu.vector_store %arg7[%c3_96, %c3_97, %c0_98], %176 {strides = array<i32>} : memref<5x8x128xf32, #tpu.memory_space<vmem>>, vector<1x1x128xf32>,
    %c32_i32_99 = arith.constant 32 : i32
    %177 = arith.addi %c32_i32_99, %139 : i32
    %178 = arith.index_cast %177 : i32 to index
    %179 = memref.load %arg2[%178] : memref<40xi32, #tpu.memory_space<smem>>
    %180 = arith.index_cast %179 : i32 to index
    %c0_100 = arith.constant 0 : index
    %181 = vector.load %arg4[%180, %c0_100] : memref<64x128xf32, #tpu.memory_space<vmem>>, vector<1x128xf32>
    %c4_101 = arith.constant 4 : index
    %c3_102 = arith.constant 3 : index
    %c0_103 = arith.constant 0 : index
    %182 = vector.load %arg7[%c4_101, %c3_102, %c0_103] : memref<5x8x128xf32, #tpu.memory_space<vmem>>, vector<1x1x128xf32>
    %183 = vector.shape_cast %182 : vector<1x1x128xf32> to vector<1x128xf32>
    %184 = vector.shape_cast %181 : vector<1x128xf32> to vector<1x1x128xf32>
    tpu.vector_store %arg7[%c4_101, %c3_102, %c0_103], %184 {strides = array<i32>} : memref<5x8x128xf32, #tpu.memory_space<vmem>>, vector<1x1x128xf32>,
    %c4_i32 = arith.constant 4 : i32
    %185 = arith.addi %0, %c4_i32 : i32
    %186 = arith.index_cast %185 : i32 to index
    %187 = memref.load %arg1[%186] : memref<8xi32, #tpu.memory_space<smem>>
    %188 = arith.index_cast %187 : i32 to index
    %c0_104 = arith.constant 0 : index
    %189 = vector.load %arg3[%188, %c0_104] : memref<64x128xf32, #tpu.memory_space<vmem>>, vector<1x128xf32>
    %c4_105 = arith.constant 4 : index
    %c0_106 = arith.constant 0 : index
    %190 = vector.load %arg6[%c4_105, %c0_106] : memref<8x128xf32, #tpu.memory_space<vmem>>, vector<1x128xf32>
    tpu.vector_store %arg6[%c4_105, %c0_106], %189 {strides = array<i32>} : memref<8x128xf32, #tpu.memory_space<vmem>>, vector<1x128xf32>,
    %c0_i32_107 = arith.constant 0 : i32
    %191 = arith.addi %c0_i32_107, %185 : i32
    %192 = arith.index_cast %191 : i32 to index
    %193 = memref.load %arg2[%192] : memref<40xi32, #tpu.memory_space<smem>>
    %194 = arith.index_cast %193 : i32 to index
    %c0_108 = arith.constant 0 : index
    %195 = vector.load %arg4[%194, %c0_108] : memref<64x128xf32, #tpu.memory_space<vmem>>, vector<1x128xf32>
    %c0_109 = arith.constant 0 : index
    %c4_110 = arith.constant 4 : index
    %c0_111 = arith.constant 0 : index
    %196 = vector.load %arg7[%c0_109, %c4_110, %c0_111] : memref<5x8x128xf32, #tpu.memory_space<vmem>>, vector<1x1x128xf32>
    %197 = vector.shape_cast %196 : vector<1x1x128xf32> to vector<1x128xf32>
    %198 = vector.shape_cast %195 : vector<1x128xf32> to vector<1x1x128xf32>
    tpu.vector_store %arg7[%c0_109, %c4_110, %c0_111], %198 {strides = array<i32>} : memref<5x8x128xf32, #tpu.memory_space<vmem>>, vector<1x1x128xf32>,
    %c8_i32_112 = arith.constant 8 : i32
    %199 = arith.addi %c8_i32_112, %185 : i32
    %200 = arith.index_cast %199 : i32 to index
    %201 = memref.load %arg2[%200] : memref<40xi32, #tpu.memory_space<smem>>
    %202 = arith.index_cast %201 : i32 to index
    %c0_113 = arith.constant 0 : index
    %203 = vector.load %arg4[%202, %c0_113] : memref<64x128xf32, #tpu.memory_space<vmem>>, vector<1x128xf32>
    %c1_114 = arith.constant 1 : index
    %c4_115 = arith.constant 4 : index
    %c0_116 = arith.constant 0 : index
    %204 = vector.load %arg7[%c1_114, %c4_115, %c0_116] : memref<5x8x128xf32, #tpu.memory_space<vmem>>, vector<1x1x128xf32>
    %205 = vector.shape_cast %204 : vector<1x1x128xf32> to vector<1x128xf32>
    %206 = vector.shape_cast %203 : vector<1x128xf32> to vector<1x1x128xf32>
    tpu.vector_store %arg7[%c1_114, %c4_115, %c0_116], %206 {strides = array<i32>} : memref<5x8x128xf32, #tpu.memory_space<vmem>>, vector<1x1x128xf32>,
    %c16_i32_117 = arith.constant 16 : i32
    %207 = arith.addi %c16_i32_117, %185 : i32
    %208 = arith.index_cast %207 : i32 to index
    %209 = memref.load %arg2[%208] : memref<40xi32, #tpu.memory_space<smem>>
    %210 = arith.index_cast %209 : i32 to index
    %c0_118 = arith.constant 0 : index
    %211 = vector.load %arg4[%210, %c0_118] : memref<64x128xf32, #tpu.memory_space<vmem>>, vector<1x128xf32>
    %c2_119 = arith.constant 2 : index
    %c4_120 = arith.constant 4 : index
    %c0_121 = arith.constant 0 : index
    %212 = vector.load %arg7[%c2_119, %c4_120, %c0_121] : memref<5x8x128xf32, #tpu.memory_space<vmem>>, vector<1x1x128xf32>
    %213 = vector.shape_cast %212 : vector<1x1x128xf32> to vector<1x128xf32>
    %214 = vector.shape_cast %211 : vector<1x128xf32> to vector<1x1x128xf32>
    tpu.vector_store %arg7[%c2_119, %c4_120, %c0_121], %214 {strides = array<i32>} : memref<5x8x128xf32, #tpu.memory_space<vmem>>, vector<1x1x128xf32>,
    %c24_i32_122 = arith.constant 24 : i32
    %215 = arith.addi %c24_i32_122, %185 : i32
    %216 = arith.index_cast %215 : i32 to index
    %217 = memref.load %arg2[%216] : memref<40xi32, #tpu.memory_space<smem>>
    %218 = arith.index_cast %217 : i32 to index
    %c0_123 = arith.constant 0 : index
    %219 = vector.load %arg4[%218, %c0_123] : memref<64x128xf32, #tpu.memory_space<vmem>>, vector<1x128xf32>
    %c3_124 = arith.constant 3 : index
    %c4_125 = arith.constant 4 : index
    %c0_126 = arith.constant 0 : index
    %220 = vector.load %arg7[%c3_124, %c4_125, %c0_126] : memref<5x8x128xf32, #tpu.memory_space<vmem>>, vector<1x1x128xf32>
    %221 = vector.shape_cast %220 : vector<1x1x128xf32> to vector<1x128xf32>
    %222 = vector.shape_cast %219 : vector<1x128xf32> to vector<1x1x128xf32>
    tpu.vector_store %arg7[%c3_124, %c4_125, %c0_126], %222 {strides = array<i32>} : memref<5x8x128xf32, #tpu.memory_space<vmem>>, vector<1x1x128xf32>,
    %c32_i32_127 = arith.constant 32 : i32
    %223 = arith.addi %c32_i32_127, %185 : i32
    %224 = arith.index_cast %223 : i32 to index
    %225 = memref.load %arg2[%224] : memref<40xi32, #tpu.memory_space<smem>>
    %226 = arith.index_cast %225 : i32 to index
    %c0_128 = arith.constant 0 : index
    %227 = vector.load %arg4[%226, %c0_128] : memref<64x128xf32, #tpu.memory_space<vmem>>, vector<1x128xf32>
    %c4_129 = arith.constant 4 : index
    %c4_130 = arith.constant 4 : index
    %c0_131 = arith.constant 0 : index
    %228 = vector.load %arg7[%c4_129, %c4_130, %c0_131] : memref<5x8x128xf32, #tpu.memory_space<vmem>>, vector<1x1x128xf32>
    %229 = vector.shape_cast %228 : vector<1x1x128xf32> to vector<1x128xf32>
    %230 = vector.shape_cast %227 : vector<1x128xf32> to vector<1x1x128xf32>
    tpu.vector_store %arg7[%c4_129, %c4_130, %c0_131], %230 {strides = array<i32>} : memref<5x8x128xf32, #tpu.memory_space<vmem>>, vector<1x1x128xf32>,
    %c5_i32 = arith.constant 5 : i32
    %231 = arith.addi %0, %c5_i32 : i32
    %232 = arith.index_cast %231 : i32 to index
    %233 = memref.load %arg1[%232] : memref<8xi32, #tpu.memory_space<smem>>
    %234 = arith.index_cast %233 : i32 to index
    %c0_132 = arith.constant 0 : index
    %235 = vector.load %arg3[%234, %c0_132] : memref<64x128xf32, #tpu.memory_space<vmem>>, vector<1x128xf32>
    %c5 = arith.constant 5 : index
    %c0_133 = arith.constant 0 : index
    %236 = vector.load %arg6[%c5, %c0_133] : memref<8x128xf32, #tpu.memory_space<vmem>>, vector<1x128xf32>
    tpu.vector_store %arg6[%c5, %c0_133], %235 {strides = array<i32>} : memref<8x128xf32, #tpu.memory_space<vmem>>, vector<1x128xf32>,
    %c0_i32_134 = arith.constant 0 : i32
    %237 = arith.addi %c0_i32_134, %231 : i32
    %238 = arith.index_cast %237 : i32 to index
    %239 = memref.load %arg2[%238] : memref<40xi32, #tpu.memory_space<smem>>
    %240 = arith.index_cast %239 : i32 to index
    %c0_135 = arith.constant 0 : index
    %241 = vector.load %arg4[%240, %c0_135] : memref<64x128xf32, #tpu.memory_space<vmem>>, vector<1x128xf32>
    %c0_136 = arith.constant 0 : index
    %c5_137 = arith.constant 5 : index
    %c0_138 = arith.constant 0 : index
    %242 = vector.load %arg7[%c0_136, %c5_137, %c0_138] : memref<5x8x128xf32, #tpu.memory_space<vmem>>, vector<1x1x128xf32>
    %243 = vector.shape_cast %242 : vector<1x1x128xf32> to vector<1x128xf32>
    %244 = vector.shape_cast %241 : vector<1x128xf32> to vector<1x1x128xf32>
    tpu.vector_store %arg7[%c0_136, %c5_137, %c0_138], %244 {strides = array<i32>} : memref<5x8x128xf32, #tpu.memory_space<vmem>>, vector<1x1x128xf32>,
    %c8_i32_139 = arith.constant 8 : i32
    %245 = arith.addi %c8_i32_139, %231 : i32
    %246 = arith.index_cast %245 : i32 to index
    %247 = memref.load %arg2[%246] : memref<40xi32, #tpu.memory_space<smem>>
    %248 = arith.index_cast %247 : i32 to index
    %c0_140 = arith.constant 0 : index
    %249 = vector.load %arg4[%248, %c0_140] : memref<64x128xf32, #tpu.memory_space<vmem>>, vector<1x128xf32>
    %c1_141 = arith.constant 1 : index
    %c5_142 = arith.constant 5 : index
    %c0_143 = arith.constant 0 : index
    %250 = vector.load %arg7[%c1_141, %c5_142, %c0_143] : memref<5x8x128xf32, #tpu.memory_space<vmem>>, vector<1x1x128xf32>
    %251 = vector.shape_cast %250 : vector<1x1x128xf32> to vector<1x128xf32>
    %252 = vector.shape_cast %249 : vector<1x128xf32> to vector<1x1x128xf32>
    tpu.vector_store %arg7[%c1_141, %c5_142, %c0_143], %252 {strides = array<i32>} : memref<5x8x128xf32, #tpu.memory_space<vmem>>, vector<1x1x128xf32>,
    %c16_i32_144 = arith.constant 16 : i32
    %253 = arith.addi %c16_i32_144, %231 : i32
    %254 = arith.index_cast %253 : i32 to index
    %255 = memref.load %arg2[%254] : memref<40xi32, #tpu.memory_space<smem>>
    %256 = arith.index_cast %255 : i32 to index
    %c0_145 = arith.constant 0 : index
    %257 = vector.load %arg4[%256, %c0_145] : memref<64x128xf32, #tpu.memory_space<vmem>>, vector<1x128xf32>
    %c2_146 = arith.constant 2 : index
    %c5_147 = arith.constant 5 : index
    %c0_148 = arith.constant 0 : index
    %258 = vector.load %arg7[%c2_146, %c5_147, %c0_148] : memref<5x8x128xf32, #tpu.memory_space<vmem>>, vector<1x1x128xf32>
    %259 = vector.shape_cast %258 : vector<1x1x128xf32> to vector<1x128xf32>
    %260 = vector.shape_cast %257 : vector<1x128xf32> to vector<1x1x128xf32>
    tpu.vector_store %arg7[%c2_146, %c5_147, %c0_148], %260 {strides = array<i32>} : memref<5x8x128xf32, #tpu.memory_space<vmem>>, vector<1x1x128xf32>,
    %c24_i32_149 = arith.constant 24 : i32
    %261 = arith.addi %c24_i32_149, %231 : i32
    %262 = arith.index_cast %261 : i32 to index
    %263 = memref.load %arg2[%262] : memref<40xi32, #tpu.memory_space<smem>>
    %264 = arith.index_cast %263 : i32 to index
    %c0_150 = arith.constant 0 : index
    %265 = vector.load %arg4[%264, %c0_150] : memref<64x128xf32, #tpu.memory_space<vmem>>, vector<1x128xf32>
    %c3_151 = arith.constant 3 : index
    %c5_152 = arith.constant 5 : index
    %c0_153 = arith.constant 0 : index
    %266 = vector.load %arg7[%c3_151, %c5_152, %c0_153] : memref<5x8x128xf32, #tpu.memory_space<vmem>>, vector<1x1x128xf32>
    %267 = vector.shape_cast %266 : vector<1x1x128xf32> to vector<1x128xf32>
    %268 = vector.shape_cast %265 : vector<1x128xf32> to vector<1x1x128xf32>
    tpu.vector_store %arg7[%c3_151, %c5_152, %c0_153], %268 {strides = array<i32>} : memref<5x8x128xf32, #tpu.memory_space<vmem>>, vector<1x1x128xf32>,
    %c32_i32_154 = arith.constant 32 : i32
    %269 = arith.addi %c32_i32_154, %231 : i32
    %270 = arith.index_cast %269 : i32 to index
    %271 = memref.load %arg2[%270] : memref<40xi32, #tpu.memory_space<smem>>
    %272 = arith.index_cast %271 : i32 to index
    %c0_155 = arith.constant 0 : index
    %273 = vector.load %arg4[%272, %c0_155] : memref<64x128xf32, #tpu.memory_space<vmem>>, vector<1x128xf32>
    %c4_156 = arith.constant 4 : index
    %c5_157 = arith.constant 5 : index
    %c0_158 = arith.constant 0 : index
    %274 = vector.load %arg7[%c4_156, %c5_157, %c0_158] : memref<5x8x128xf32, #tpu.memory_space<vmem>>, vector<1x1x128xf32>
    %275 = vector.shape_cast %274 : vector<1x1x128xf32> to vector<1x128xf32>
    %276 = vector.shape_cast %273 : vector<1x128xf32> to vector<1x1x128xf32>
    tpu.vector_store %arg7[%c4_156, %c5_157, %c0_158], %276 {strides = array<i32>} : memref<5x8x128xf32, #tpu.memory_space<vmem>>, vector<1x1x128xf32>,
    %c6_i32 = arith.constant 6 : i32
    %277 = arith.addi %0, %c6_i32 : i32
    %278 = arith.index_cast %277 : i32 to index
    %279 = memref.load %arg1[%278] : memref<8xi32, #tpu.memory_space<smem>>
    %280 = arith.index_cast %279 : i32 to index
    %c0_159 = arith.constant 0 : index
    %281 = vector.load %arg3[%280, %c0_159] : memref<64x128xf32, #tpu.memory_space<vmem>>, vector<1x128xf32>
    %c6 = arith.constant 6 : index
    %c0_160 = arith.constant 0 : index
    %282 = vector.load %arg6[%c6, %c0_160] : memref<8x128xf32, #tpu.memory_space<vmem>>, vector<1x128xf32>
    tpu.vector_store %arg6[%c6, %c0_160], %281 {strides = array<i32>} : memref<8x128xf32, #tpu.memory_space<vmem>>, vector<1x128xf32>,
    %c0_i32_161 = arith.constant 0 : i32
    %283 = arith.addi %c0_i32_161, %277 : i32
    %284 = arith.index_cast %283 : i32 to index
    %285 = memref.load %arg2[%284] : memref<40xi32, #tpu.memory_space<smem>>
    %286 = arith.index_cast %285 : i32 to index
    %c0_162 = arith.constant 0 : index
    %287 = vector.load %arg4[%286, %c0_162] : memref<64x128xf32, #tpu.memory_space<vmem>>, vector<1x128xf32>
    %c0_163 = arith.constant 0 : index
    %c6_164 = arith.constant 6 : index
    %c0_165 = arith.constant 0 : index
    %288 = vector.load %arg7[%c0_163, %c6_164, %c0_165] : memref<5x8x128xf32, #tpu.memory_space<vmem>>, vector<1x1x128xf32>
    %289 = vector.shape_cast %288 : vector<1x1x128xf32> to vector<1x128xf32>
    %290 = vector.shape_cast %287 : vector<1x128xf32> to vector<1x1x128xf32>
    tpu.vector_store %arg7[%c0_163, %c6_164, %c0_165], %290 {strides = array<i32>} : memref<5x8x128xf32, #tpu.memory_space<vmem>>, vector<1x1x128xf32>,
    %c8_i32_166 = arith.constant 8 : i32
    %291 = arith.addi %c8_i32_166, %277 : i32
    %292 = arith.index_cast %291 : i32 to index
    %293 = memref.load %arg2[%292] : memref<40xi32, #tpu.memory_space<smem>>
    %294 = arith.index_cast %293 : i32 to index
    %c0_167 = arith.constant 0 : index
    %295 = vector.load %arg4[%294, %c0_167] : memref<64x128xf32, #tpu.memory_space<vmem>>, vector<1x128xf32>
    %c1_168 = arith.constant 1 : index
    %c6_169 = arith.constant 6 : index
    %c0_170 = arith.constant 0 : index
    %296 = vector.load %arg7[%c1_168, %c6_169, %c0_170] : memref<5x8x128xf32, #tpu.memory_space<vmem>>, vector<1x1x128xf32>
    %297 = vector.shape_cast %296 : vector<1x1x128xf32> to vector<1x128xf32>
    %298 = vector.shape_cast %295 : vector<1x128xf32> to vector<1x1x128xf32>
    tpu.vector_store %arg7[%c1_168, %c6_169, %c0_170], %298 {strides = array<i32>} : memref<5x8x128xf32, #tpu.memory_space<vmem>>, vector<1x1x128xf32>,
    %c16_i32_171 = arith.constant 16 : i32
    %299 = arith.addi %c16_i32_171, %277 : i32
    %300 = arith.index_cast %299 : i32 to index
    %301 = memref.load %arg2[%300] : memref<40xi32, #tpu.memory_space<smem>>
    %302 = arith.index_cast %301 : i32 to index
    %c0_172 = arith.constant 0 : index
    %303 = vector.load %arg4[%302, %c0_172] : memref<64x128xf32, #tpu.memory_space<vmem>>, vector<1x128xf32>
    %c2_173 = arith.constant 2 : index
    %c6_174 = arith.constant 6 : index
    %c0_175 = arith.constant 0 : index
    %304 = vector.load %arg7[%c2_173, %c6_174, %c0_175] : memref<5x8x128xf32, #tpu.memory_space<vmem>>, vector<1x1x128xf32>
    %305 = vector.shape_cast %304 : vector<1x1x128xf32> to vector<1x128xf32>
    %306 = vector.shape_cast %303 : vector<1x128xf32> to vector<1x1x128xf32>
    tpu.vector_store %arg7[%c2_173, %c6_174, %c0_175], %306 {strides = array<i32>} : memref<5x8x128xf32, #tpu.memory_space<vmem>>, vector<1x1x128xf32>,
    %c24_i32_176 = arith.constant 24 : i32
    %307 = arith.addi %c24_i32_176, %277 : i32
    %308 = arith.index_cast %307 : i32 to index
    %309 = memref.load %arg2[%308] : memref<40xi32, #tpu.memory_space<smem>>
    %310 = arith.index_cast %309 : i32 to index
    %c0_177 = arith.constant 0 : index
    %311 = vector.load %arg4[%310, %c0_177] : memref<64x128xf32, #tpu.memory_space<vmem>>, vector<1x128xf32>
    %c3_178 = arith.constant 3 : index
    %c6_179 = arith.constant 6 : index
    %c0_180 = arith.constant 0 : index
    %312 = vector.load %arg7[%c3_178, %c6_179, %c0_180] : memref<5x8x128xf32, #tpu.memory_space<vmem>>, vector<1x1x128xf32>
    %313 = vector.shape_cast %312 : vector<1x1x128xf32> to vector<1x128xf32>
    %314 = vector.shape_cast %311 : vector<1x128xf32> to vector<1x1x128xf32>
    tpu.vector_store %arg7[%c3_178, %c6_179, %c0_180], %314 {strides = array<i32>} : memref<5x8x128xf32, #tpu.memory_space<vmem>>, vector<1x1x128xf32>,
    %c32_i32_181 = arith.constant 32 : i32
    %315 = arith.addi %c32_i32_181, %277 : i32
    %316 = arith.index_cast %315 : i32 to index
    %317 = memref.load %arg2[%316] : memref<40xi32, #tpu.memory_space<smem>>
    %318 = arith.index_cast %317 : i32 to index
    %c0_182 = arith.constant 0 : index
    %319 = vector.load %arg4[%318, %c0_182] : memref<64x128xf32, #tpu.memory_space<vmem>>, vector<1x128xf32>
    %c4_183 = arith.constant 4 : index
    %c6_184 = arith.constant 6 : index
    %c0_185 = arith.constant 0 : index
    %320 = vector.load %arg7[%c4_183, %c6_184, %c0_185] : memref<5x8x128xf32, #tpu.memory_space<vmem>>, vector<1x1x128xf32>
    %321 = vector.shape_cast %320 : vector<1x1x128xf32> to vector<1x128xf32>
    %322 = vector.shape_cast %319 : vector<1x128xf32> to vector<1x1x128xf32>
    tpu.vector_store %arg7[%c4_183, %c6_184, %c0_185], %322 {strides = array<i32>} : memref<5x8x128xf32, #tpu.memory_space<vmem>>, vector<1x1x128xf32>,
    %c7_i32 = arith.constant 7 : i32
    %323 = arith.addi %0, %c7_i32 : i32
    %324 = arith.index_cast %323 : i32 to index
    %325 = memref.load %arg1[%324] : memref<8xi32, #tpu.memory_space<smem>>
    %326 = arith.index_cast %325 : i32 to index
    %c0_186 = arith.constant 0 : index
    %327 = vector.load %arg3[%326, %c0_186] : memref<64x128xf32, #tpu.memory_space<vmem>>, vector<1x128xf32>
    %c7 = arith.constant 7 : index
    %c0_187 = arith.constant 0 : index
    %328 = vector.load %arg6[%c7, %c0_187] : memref<8x128xf32, #tpu.memory_space<vmem>>, vector<1x128xf32>
    tpu.vector_store %arg6[%c7, %c0_187], %327 {strides = array<i32>} : memref<8x128xf32, #tpu.memory_space<vmem>>, vector<1x128xf32>,
    %c0_i32_188 = arith.constant 0 : i32
    %329 = arith.addi %c0_i32_188, %323 : i32
    %330 = arith.index_cast %329 : i32 to index
    %331 = memref.load %arg2[%330] : memref<40xi32, #tpu.memory_space<smem>>
    %332 = arith.index_cast %331 : i32 to index
    %c0_189 = arith.constant 0 : index
    %333 = vector.load %arg4[%332, %c0_189] : memref<64x128xf32, #tpu.memory_space<vmem>>, vector<1x128xf32>
    %c0_190 = arith.constant 0 : index
    %c7_191 = arith.constant 7 : index
    %c0_192 = arith.constant 0 : index
    %334 = vector.load %arg7[%c0_190, %c7_191, %c0_192] : memref<5x8x128xf32, #tpu.memory_space<vmem>>, vector<1x1x128xf32>
    %335 = vector.shape_cast %334 : vector<1x1x128xf32> to vector<1x128xf32>
    %336 = vector.shape_cast %333 : vector<1x128xf32> to vector<1x1x128xf32>
    tpu.vector_store %arg7[%c0_190, %c7_191, %c0_192], %336 {strides = array<i32>} : memref<5x8x128xf32, #tpu.memory_space<vmem>>, vector<1x1x128xf32>,
    %c8_i32_193 = arith.constant 8 : i32
    %337 = arith.addi %c8_i32_193, %323 : i32
    %338 = arith.index_cast %337 : i32 to index
    %339 = memref.load %arg2[%338] : memref<40xi32, #tpu.memory_space<smem>>
    %340 = arith.index_cast %339 : i32 to index
    %c0_194 = arith.constant 0 : index
    %341 = vector.load %arg4[%340, %c0_194] : memref<64x128xf32, #tpu.memory_space<vmem>>, vector<1x128xf32>
    %c1_195 = arith.constant 1 : index
    %c7_196 = arith.constant 7 : index
    %c0_197 = arith.constant 0 : index
    %342 = vector.load %arg7[%c1_195, %c7_196, %c0_197] : memref<5x8x128xf32, #tpu.memory_space<vmem>>, vector<1x1x128xf32>
    %343 = vector.shape_cast %342 : vector<1x1x128xf32> to vector<1x128xf32>
    %344 = vector.shape_cast %341 : vector<1x128xf32> to vector<1x1x128xf32>
    tpu.vector_store %arg7[%c1_195, %c7_196, %c0_197], %344 {strides = array<i32>} : memref<5x8x128xf32, #tpu.memory_space<vmem>>, vector<1x1x128xf32>,
    %c16_i32_198 = arith.constant 16 : i32
    %345 = arith.addi %c16_i32_198, %323 : i32
    %346 = arith.index_cast %345 : i32 to index
    %347 = memref.load %arg2[%346] : memref<40xi32, #tpu.memory_space<smem>>
    %348 = arith.index_cast %347 : i32 to index
    %c0_199 = arith.constant 0 : index
    %349 = vector.load %arg4[%348, %c0_199] : memref<64x128xf32, #tpu.memory_space<vmem>>, vector<1x128xf32>
    %c2_200 = arith.constant 2 : index
    %c7_201 = arith.constant 7 : index
    %c0_202 = arith.constant 0 : index
    %350 = vector.load %arg7[%c2_200, %c7_201, %c0_202] : memref<5x8x128xf32, #tpu.memory_space<vmem>>, vector<1x1x128xf32>
    %351 = vector.shape_cast %350 : vector<1x1x128xf32> to vector<1x128xf32>
    %352 = vector.shape_cast %349 : vector<1x128xf32> to vector<1x1x128xf32>
    tpu.vector_store %arg7[%c2_200, %c7_201, %c0_202], %352 {strides = array<i32>} : memref<5x8x128xf32, #tpu.memory_space<vmem>>, vector<1x1x128xf32>,
    %c24_i32_203 = arith.constant 24 : i32
    %353 = arith.addi %c24_i32_203, %323 : i32
    %354 = arith.index_cast %353 : i32 to index
    %355 = memref.load %arg2[%354] : memref<40xi32, #tpu.memory_space<smem>>
    %356 = arith.index_cast %355 : i32 to index
    %c0_204 = arith.constant 0 : index
    %357 = vector.load %arg4[%356, %c0_204] : memref<64x128xf32, #tpu.memory_space<vmem>>, vector<1x128xf32>
    %c3_205 = arith.constant 3 : index
    %c7_206 = arith.constant 7 : index
    %c0_207 = arith.constant 0 : index
    %358 = vector.load %arg7[%c3_205, %c7_206, %c0_207] : memref<5x8x128xf32, #tpu.memory_space<vmem>>, vector<1x1x128xf32>
    %359 = vector.shape_cast %358 : vector<1x1x128xf32> to vector<1x128xf32>
    %360 = vector.shape_cast %357 : vector<1x128xf32> to vector<1x1x128xf32>
    tpu.vector_store %arg7[%c3_205, %c7_206, %c0_207], %360 {strides = array<i32>} : memref<5x8x128xf32, #tpu.memory_space<vmem>>, vector<1x1x128xf32>,
    %c32_i32_208 = arith.constant 32 : i32
    %361 = arith.addi %c32_i32_208, %323 : i32
    %362 = arith.index_cast %361 : i32 to index
    %363 = memref.load %arg2[%362] : memref<40xi32, #tpu.memory_space<smem>>
    %364 = arith.index_cast %363 : i32 to index
    %c0_209 = arith.constant 0 : index
    %365 = vector.load %arg4[%364, %c0_209] : memref<64x128xf32, #tpu.memory_space<vmem>>, vector<1x128xf32>
    %c4_210 = arith.constant 4 : index
    %c7_211 = arith.constant 7 : index
    %c0_212 = arith.constant 0 : index
    %366 = vector.load %arg7[%c4_210, %c7_211, %c0_212] : memref<5x8x128xf32, #tpu.memory_space<vmem>>, vector<1x1x128xf32>
    %367 = vector.shape_cast %366 : vector<1x1x128xf32> to vector<1x128xf32>
    %368 = vector.shape_cast %365 : vector<1x128xf32> to vector<1x1x128xf32>
    tpu.vector_store %arg7[%c4_210, %c7_211, %c0_212], %368 {strides = array<i32>} : memref<5x8x128xf32, #tpu.memory_space<vmem>>, vector<1x1x128xf32>,
    %c0_213 = arith.constant 0 : index
    %c0_214 = arith.constant 0 : index
    %369 = vector.load %arg6[%c0_213, %c0_214] : memref<8x128xf32, #tpu.memory_space<vmem>>, vector<8x128xf32>
    %c0_215 = arith.constant 0 : index
    %c0_216 = arith.constant 0 : index
    %c0_217 = arith.constant 0 : index
    %370 = vector.load %arg7[%c0_215, %c0_216, %c0_217] : memref<5x8x128xf32, #tpu.memory_space<vmem>>, vector<5x8x128xf32>
    %371 = vector.shape_cast %369 : vector<8x128xf32> to vector<1x8x128xf32>
    %372 = vector.broadcast %371 : vector<1x8x128xf32> to vector<5x8x128xf32>
    %373 = arith.mulf %370, %372 : vector<5x8x128xf32>
    %cst = arith.constant dense<0.000000e+00> : vector<5x8xf32>
    %374 = vector.multi_reduction <add>, %373, %cst [2] : vector<5x8x128xf32> to vector<5x8xf32>
    %375 = tpu.iota {dimensions = array<i32: 0>} : vector<5x8xi32>
    %c0_i32_218 = arith.constant 0 : i32
    %376 = vector.broadcast %c0_i32_218 : i32 to vector<5x8xi32>
    %377 = arith.cmpi eq, %375, %376 : vector<5x8xi32>
    %cst_219 = arith.constant 0.000000e+00 : f32
    %378 = vector.broadcast %cst_219 : f32 to vector<5x8xf32>
    %379 = arith.subf %378, %374 : vector<5x8xf32>
    %380 = arith.select %377, %374, %379 : vector<5x8xi1>, vector<5x8xf32>
    %cst_220 = arith.constant 0.000000e+00 : f32
    %381 = vector.broadcast %cst_220 : f32 to vector<5x8xf32>
    %382 = arith.minimumf %380, %381 : vector<5x8xf32>
    %383 = math.absf %380 : vector<5x8xf32>
    %cst_221 = arith.constant 0.000000e+00 : f32
    %384 = vector.broadcast %cst_221 : f32 to vector<5x8xf32>
    %385 = arith.subf %384, %383 : vector<5x8xf32>
    %386 = math.exp %385 : vector<5x8xf32>
    %387 = math.log1p %386 : vector<5x8xf32>
    %388 = arith.subf %382, %387 : vector<5x8xf32>
    %cst_222 = arith.constant dense<0.000000e+00> : vector<8xf32>
    %389 = vector.multi_reduction <add>, %388, %cst_222 [0] : vector<5x8xf32> to vector<8xf32>
    %390 = vector.shape_cast %389 : vector<8xf32> to vector<1x8xf32>
    %c0_223 = arith.constant 0 : index
    %c0_224 = arith.constant 0 : index
    %c0_225 = arith.constant 0 : index
    %391 = vector.load %arg5[%c0_223, %c0_224, %c0_225] : memref<1x1x8xf32, #tpu.memory_space<vmem>>, vector<1x1x8xf32>
    %392 = vector.shape_cast %391 : vector<1x1x8xf32> to vector<1x8xf32>
    %393 = vector.shape_cast %390 : vector<1x8xf32> to vector<1x1x8xf32>
    tpu.vector_store %arg5[%c0_223, %c0_224, %c0_225], %393 {strides = array<i32>} : memref<1x1x8xf32, #tpu.memory_space<vmem>>, vector<1x1x8xf32>,
    return
  }
  func.func @transform_0(%arg0: i32, %arg1: memref<8xi32, #tpu.memory_space<smem>>, %arg2: memref<40xi32, #tpu.memory_space<smem>>) -> (i32, i32) {
    %c0_i32 = arith.constant 0 : i32
    %c0_i32_0 = arith.constant 0 : i32
    %c0_i32_1 = arith.constant 0 : i32
    return %c0_i32, %c0_i32_0 : i32, i32
  }
  func.func @transform_1(%arg0: i32, %arg1: memref<8xi32, #tpu.memory_space<smem>>, %arg2: memref<40xi32, #tpu.memory_space<smem>>) -> (i32, i32) {
    %c0_i32 = arith.constant 0 : i32
    %c0_i32_0 = arith.constant 0 : i32
    %c0_i32_1 = arith.constant 0 : i32
    return %c0_i32, %c0_i32_0 : i32, i32
  }
  func.func @transform_2(%arg0: i32, %arg1: memref<8xi32, #tpu.memory_space<smem>>, %arg2: memref<40xi32, #tpu.memory_space<smem>>) -> (i32, i32, i32) {
    %c0_i32 = arith.constant 0 : i32
    %c0_i32_0 = arith.constant 0 : i32
    %c0_i32_1 = arith.constant 0 : i32
    return %arg0, %c0_i32, %c0_i32_0 : i32, i32, i32
  }
}

</mosaic_0001>

<bundles_post_ra>
// kernel: skipgram_loss.1
= control target key start
LH: loop header
LB: loop body
LE: loop exit
PB: predicated region body
PF: predicated region fallthrough
CT: control target
= control target key end

     0   :  { %s733_s0 = inlined_call_operand.vmem [shape: s32[8], index: 0, kind: input, shape index: {}]   ;;  %s734_s2 = inlined_call_operand.vmem [shape: f32[64,128], index: 2, kind: input, shape index: {}]   ;;  %s735_s3 = inlined_call_operand.vmem [shape: f32[64,128], index: 3, kind: input, shape index: {}]   ;;  %s736_s4 = inlined_call_operand.vmem [shape: f32[1,1,8], index: 4, kind: output, shape index: {}]   ;;  %s737_s1 = inlined_call_operand.vmem [shape: s32[40], index: 1, kind: input, shape index: {}]  }
   0x1   :  { %s9_s17 = sshll.u32 %s733_s0, 4  ;;  %s13_s20 = sshll.u32 %s737_s1, 4  ;;  %s10_s17 = int_to_ptr.vmem [resolvable:$true] %s9_s17  ;;  %s14_s20 = int_to_ptr.vmem [resolvable:$true] %s13_s20 }
   0x2   :  { %s484_s21 = scalar_lea.vmem %s10_s17, 16  ;;  %p489_p1 = scmp.lt.s32.totalorder %s10_s17, %s10_s17 }
   0x3   :  { %p485_p0 = scmp.ne.s32.totalorder %s10_s17, %s484_s21  ;;  %p490_p2 = scmp.lt.s32.totalorder %s484_s21, %s484_s21 }
   0x5   :  { %p491_p3 = por %p490_p2, %p489_p1 }
   0x7   :  { %p492_p4 = pnand %p491_p3, %p485_p0 }
   0x9   :  { %495 = shalt.err (!%p492_p4)  }
   0xa   :  { %s510_s22 = smov [#allocation5]   ;;  %s496_s23 = scalar_lea.vmem %s14_s20, 16 }
   0xb   :  { %12 = dma.vmem_to_smem %s10_s17, 16, %s510_s22, [#allocation4] }
   0xc   :  { %p497_p5 = scmp.ne.s32.totalorder %s14_s20, %s496_s23  ;;  %p501_p6 = scmp.lt.s32.totalorder %s14_s20, %s14_s20 }
   0xd   :  { %p502_p7 = scmp.lt.s32.totalorder %s496_s23, %s496_s23 }
   0xf   :  { %p503_p8 = por %p502_p7, %p501_p6 }
  0x11   :  { %p504_p9 = pnand %p503_p8, %p497_p5 }
  0x13   :  { %507 = shalt.err (!%p504_p9)  }
  0x14   :  { %s511_s0 = smov [#allocation6]  }
  0x15   :  { %16 = dma.vmem_to_smem %s14_s20, 16, %s511_s0, [#allocation4] }
  0x16   :  { %508 = dma.done.wait [#allocation4], 32 }
  0x17   :  { %509 = vsyncadd [#allocation4], 4294967264 }
  0x18   :  { %18 = sfence }
  0x19   :  { %s24_s1 = sld [smem:[#allocation5]]  ;;  %v280_v60 = vlaneseq  ;;  %vm315_vm0 = vcmask 1041409   ;;  %vm317_vm1 = vcmask 1042434   ;;  %vm319_vm2 = vcmask 1043459  }
  0x1a   :  { %s28_s24 = sld [smem:[#allocation6]]  ;;  %vm321_vm3 = vcmask 1044484   ;;  %vm370_vm6 = vcmask 61440   ;;  %vm378_vm7 = vcmask 57344  }
  0x1b   :  { %s436_s25 = sld [smem:[#allocation5 + $0x1]]  ;;  %v281_v62 = vshrl.u32 %v280_v60, 7  ;;  %v294_v63 = vand.u32 127, %v280_v60 }
  0x1c   :  { %s437_s26 = sld [smem:[#allocation6 + $0x1]] }
  0x1d   :  { %s442_s27 = sld [smem:[#allocation5 + $0x2]]  ;;  %vm282_vm4 = vcmp.eq.s32.totalorder %v281_v62, 0 }
  0x1e   :  { %s443_s28 = sld [smem:[#allocation6 + $0x2]] }
  0x1f   :  { %s25_s5 = scalar_lea.vmem %s734_s2, %s24_s1  ;;  %s448_s6 = sld [smem:[#allocation5 + $0x3]] }
  0x20   :  { %v26_v0 = vld [vmem:[%s25_s5] sm:$0x1]  ;;  %s29_s9 = scalar_lea.vmem %s735_s3, %s28_s24  ;;  %s449_s10 = sld [smem:[#allocation6 + $0x3]] }
  0x21   :  { %27 = vst [vmem:[#allocation2] sm:$0x1] %v26_v0  ;;  %v30_v1 = vld [vmem:[%s29_s9] sm:$0x1]  ;;  %s58_s13 = scalar_lea.vmem %s734_s2, %s436_s25  ;;  %s454_s14 = sld [smem:[#allocation5 + $0x4]] }
  0x22   :  { %31 = vst [vmem:[#allocation3] sm:$0x1] %v30_v1  ;;  %v59_v2 = vld [vmem:[%s58_s13] sm:$0x1]  ;;  %s62_s17 = scalar_lea.vmem %s735_s3, %s437_s26  ;;  %s455_s18 = sld [smem:[#allocation6 + $0x4]] }
  0x23   :  { %60 = vst [vmem:[#allocation2 + $0x1] sm:$0x1] %v59_v2  ;;  %v63_v3 = vld [vmem:[%s62_s17] sm:$0x1]  ;;  %s87_s21 = scalar_lea.vmem %s734_s2, %s442_s27  ;;  %s460_s22 = sld [smem:[#allocation5 + $0x5]]  ;;  %v297_v2 = vsub.s32 %v294_v63, %v281_v62 }
  0x24   :  { %64 = vst [vmem:[#allocation3 + $0x1] sm:$0x1] %v63_v3  ;;  %v88_v4 = vld [vmem:[%s87_s21] sm:$0x1]  ;;  %s91_s1 = scalar_lea.vmem %s735_s3, %s443_s28  ;;  %s461_s24 = sld [smem:[#allocation6 + $0x5]] }
  0x25   :  { %89 = vst [vmem:[#allocation2 + $0x2] sm:$0x1] %v88_v4  ;;  %v92_v5 = vld [vmem:[%s91_s1] sm:$0x1]  ;;  %s116_s26 = scalar_lea.vmem %s734_s2, %s448_s6  ;;  %s466_s30 = sld [smem:[#allocation5 + $0x6]] }
  0x26   :  { %93 = vst [vmem:[#allocation3 + $0x2] sm:$0x1] %v92_v5  ;;  %v117_v6 = vld [vmem:[%s116_s26] sm:$0x1]  ;;  %s120_s27 = scalar_lea.vmem %s735_s3, %s449_s10  ;;  %s467_s8 = sld [smem:[#allocation6 + $0x6]] }
  0x27   :  { %118 = vst [vmem:[#allocation2 + $0x3] sm:$0x1] %v117_v6  ;;  %v121_v7 = vld [vmem:[%s120_s27] sm:$0x1]  ;;  %s145_s28 = scalar_lea.vmem %s734_s2, %s454_s14  ;;  %s472_s12 = sld [smem:[#allocation5 + $0x7]] }
  0x28   :  { %122 = vst [vmem:[#allocation3 + $0x3] sm:$0x1] %v121_v7  ;;  %v146_v8 = vld [vmem:[%s145_s28] sm:$0x1]  ;;  %s149_s6 = scalar_lea.vmem %s735_s3, %s455_s18  ;;  %s473_s16 = sld [smem:[#allocation6 + $0x7]] }
  0x29   :  { %147 = vst [vmem:[#allocation2 + $0x4] sm:$0x1] %v146_v8  ;;  %v150_v9 = vld [vmem:[%s149_s6] sm:$0x1]  ;;  %s174_s10 = scalar_lea.vmem %s734_s2, %s460_s22  ;;  %s433_s20 = sld [smem:[#allocation6 + $0x10]] }
  0x2a   :  { %151 = vst [vmem:[#allocation3 + $0x4] sm:$0x1] %v150_v9  ;;  %v175_v10 = vld [vmem:[%s174_s10] sm:$0x1]  ;;  %s178_s14 = scalar_lea.vmem %s735_s3, %s461_s24  ;;  %s439_s0 = sld [smem:[#allocation6 + $0x11]] }
  0x2b   :  { %176 = vst [vmem:[#allocation2 + $0x5] sm:$0x1] %v175_v10  ;;  %v179_v11 = vld [vmem:[%s178_s14] sm:$0x1]  ;;  %s203_s18 = scalar_lea.vmem %s734_s2, %s466_s30  ;;  %s445_s29 = sld [smem:[#allocation6 + $0x12]] }
  0x2c   :  { %180 = vst [vmem:[#allocation3 + $0x5] sm:$0x1] %v179_v11  ;;  %v204_v12 = vld [vmem:[%s203_s18] sm:$0x1]  ;;  %s207_s22 = scalar_lea.vmem %s735_s3, %s467_s8  ;;  %s451_s7 = sld [smem:[#allocation6 + $0x13]] }
  0x2d   :  { %205 = vst [vmem:[#allocation2 + $0x6] sm:$0x1] %v204_v12  ;;  %v208_v13 = vld [vmem:[%s207_s22] sm:$0x1]  ;;  %s232_s24 = scalar_lea.vmem %s734_s2, %s472_s12  ;;  %s457_s11 = sld [smem:[#allocation6 + $0x14]] }
  0x2e   :  { %209 = vst [vmem:[#allocation3 + $0x6] sm:$0x1] %v208_v13  ;;  %v233_v14 = vld [vmem:[%s232_s24] sm:$0x1]  ;;  %s236_s30 = scalar_lea.vmem %s735_s3, %s473_s16  ;;  %s463_s15 = sld [smem:[#allocation6 + $0x15]] }
  0x2f   :  { %234 = vst [vmem:[#allocation2 + $0x7] sm:$0x1] %v233_v14  ;;  %v237_v15 = vld [vmem:[%s236_s30] sm:$0x1]  ;;  %s40_s8 = scalar_lea.vmem %s735_s3, %s433_s20  ;;  %s469_s19 = sld [smem:[#allocation6 + $0x16]] }
  0x30   :  { %238 = vst [vmem:[#allocation3 + $0x7] sm:$0x1] %v237_v15  ;;  %v41_v16 = vld [vmem:[%s40_s8] sm:$0x1]  ;;  %s72_s2 = scalar_lea.vmem %s735_s3, %s439_s0  ;;  %s475_s12 = sld [smem:[#allocation6 + $0x17]] }
  0x31   :  { %43 = vst [vmem:[#allocation3 + $0x10] sm:$0x1] %v41_v16  ;;  %v73_v17 = vld [vmem:[%s72_s2] sm:$0x1]  ;;  %s101_s16 = scalar_lea.vmem %s735_s3, %s445_s29  ;;  %s600_s1 = sld [smem:[#allocation6 + $0x8]] }
  0x32   :  { %74 = vst [vmem:[#allocation3 + $0x11] sm:$0x1] %v73_v17  ;;  %v102_v18 = vld [vmem:[%s101_s16] sm:$0x1]  ;;  %s130_s18 = scalar_lea.vmem %s735_s3, %s451_s7  ;;  %s605_s26 = sld [smem:[#allocation6 + $0x9]] }
  0x33   :  { %103 = vst [vmem:[#allocation3 + $0x12] sm:$0x1] %v102_v18  ;;  %v131_v19 = vld [vmem:[%s130_s18] sm:$0x1]  ;;  %s159_s22 = scalar_lea.vmem %s735_s3, %s457_s11  ;;  %s610_s27 = sld [smem:[#allocation6 + $0xa]] }
  0x34   :  { %132 = vst [vmem:[#allocation3 + $0x13] sm:$0x1] %v131_v19  ;;  %v160_v20 = vld [vmem:[%s159_s22] sm:$0x1]  ;;  %s188_s24 = scalar_lea.vmem %s735_s3, %s463_s15  ;;  %s615_s28 = sld [smem:[#allocation6 + $0xb]] }
  0x35   :  { %161 = vst [vmem:[#allocation3 + $0x14] sm:$0x1] %v160_v20  ;;  %v189_v21 = vld [vmem:[%s188_s24] sm:$0x1]  ;;  %s217_s30 = scalar_lea.vmem %s735_s3, %s469_s19  ;;  %s620_s6 = sld [smem:[#allocation6 + $0xc]] }
  0x36   :  { %v622_v22 = vld [vmem:[#allocation2] sm:$0xff]  ;;  %190 = vst [vmem:[#allocation3 + $0x15] sm:$0x1] %v189_v21  ;;  %s246_s15 = scalar_lea.vmem %s735_s3, %s475_s12  ;;  %s627_s8 = sld [smem:[#allocation6 + $0xd]] }
  0x37   :  { %v218_v23 = vld [vmem:[%s217_s30] sm:$0x1]  ;;  %v260_v24 = vld [vmem:[#allocation3] sm:$0xff]  ;;  %s34_s19 = scalar_lea.vmem %s735_s3, %s600_s1  ;;  %s468_s2 = sld [smem:[#allocation6 + $0xe]] }
  0x38   :  { %219 = vst [vmem:[#allocation3 + $0x16] sm:$0x1] %v218_v23  ;;  %v247_v25 = vld [vmem:[%s246_s15] sm:$0x1]  ;;  %v265_v26 = vmul.f32 %v260_v24, %v622_v22  ;;  %s67_s12 = scalar_lea.vmem %s735_s3, %s605_s26  ;;  %s474_s16 = sld [smem:[#allocation6 + $0xf]] }
  0x39   :  { %248 = vst [vmem:[#allocation3 + $0x17] sm:$0x1] %v247_v25  ;;  %v35_v27 = vld [vmem:[%s34_s19] sm:$0x1]  ;;  %s96_s18 = scalar_lea.vmem %s735_s3, %s610_s27  ;;  %s642_s0 = sld [smem:[#allocation6 + $0x18]] }
  0x3a   :  { %37 = vst [vmem:[#allocation3 + $0x8] sm:$0x1] %v35_v27  ;;  %v68_v28 = vld [vmem:[%s67_s12] sm:$0x1]  ;;  %270 = vadd.xlane.f32.xlu0 %v265_v26  ;;  %s125_s22 = scalar_lea.vmem %s735_s3, %s615_s28  ;;  %s440_s29 = sld [smem:[#allocation6 + $0x19]] }
  0x3b   :  { %69 = vst [vmem:[#allocation3 + $0x9] sm:$0x1] %v68_v28  ;;  %v97_v29 = vld [vmem:[%s96_s18] sm:$0x1]  ;;  %s154_s24 = scalar_lea.vmem %s735_s3, %s620_s6  ;;  %s652_s7 = sld [smem:[#allocation6 + $0x1a]] }
  0x3c   :  { %98 = vst [vmem:[#allocation3 + $0xa] sm:$0x1] %v97_v29  ;;  %v126_v30 = vld [vmem:[%s125_s22] sm:$0x1]  ;;  %s183_s30 = scalar_lea.vmem %s735_s3, %s627_s8  ;;  %s658_s11 = sld [smem:[#allocation6 + $0x1b]] }
  0x3d   :  { %127 = vst [vmem:[#allocation3 + $0xb] sm:$0x1] %v126_v30  ;;  %v155_v31 = vld [vmem:[%s154_s24] sm:$0x1]  ;;  %s212_s15 = scalar_lea.vmem %s735_s3, %s468_s2  ;;  %s663_s10 = sld [smem:[#allocation6 + $0x1c]] }
  0x3e   :  { %156 = vst [vmem:[#allocation3 + $0xc] sm:$0x1] %v155_v31  ;;  %v184_v32 = vld [vmem:[%s183_s30] sm:$0x1]  ;;  %s241_s19 = scalar_lea.vmem %s735_s3, %s474_s16  ;;  %s668_s23 = sld [smem:[#allocation6 + $0x1d]] }
  0x3f   :  { %185 = vst [vmem:[#allocation3 + $0xd] sm:$0x1] %v184_v32  ;;  %v213_v33 = vld [vmem:[%s212_s15] sm:$0x1]  ;;  %s46_s12 = scalar_lea.vmem %s735_s3, %s642_s0  ;;  %s470_s2 = sld [smem:[#allocation6 + $0x1e]] }
  0x40   :  { %v262_v34 = vld [vmem:[#allocation3 + $0x10] sm:$0xff]  ;;  %214 = vst [vmem:[#allocation3 + $0xe] sm:$0x1] %v213_v33  ;;  %v242_v35 = vld [vmem:[%s241_s19] sm:$0x1]  ;;  %s77_s16 = scalar_lea.vmem %s735_s3, %s440_s29  ;;  %s476_s18 = sld [smem:[#allocation6 + $0x1f]] }
  0x41   :  { %v267_v36 = vmul.f32 %v262_v34, %v622_v22  ;;  %243 = vst [vmem:[#allocation3 + $0xf] sm:$0x1] %v242_v35  ;;  %v47_v37 = vld [vmem:[%s46_s12] sm:$0x1]  ;;  %s106_s22 = scalar_lea.vmem %s735_s3, %s652_s7  ;;  %s682_s26 = sld [smem:[#allocation6 + $0x20]] }
  0x42   :  { %49 = vst [vmem:[#allocation3 + $0x18] sm:$0x1] %v47_v37  ;;  %v78_v38 = vld [vmem:[%s77_s16] sm:$0x1]  ;;  %s135_s24 = scalar_lea.vmem %s735_s3, %s658_s11  ;;  %s441_s27 = sld [smem:[#allocation6 + $0x21]] }
  0x43   :  { %274 = vadd.xlane.f32.xlu1 %v267_v36  ;;  %79 = vst [vmem:[#allocation3 + $0x19] sm:$0x1] %v78_v38  ;;  %v107_v39 = vld [vmem:[%s106_s22] sm:$0x1]  ;;  %s164_s30 = scalar_lea.vmem %s735_s3, %s663_s10  ;;  %s447_s28 = sld [smem:[#allocation6 + $0x22]] }
  0x44   :  { %108 = vst [vmem:[#allocation3 + $0x1a] sm:$0x1] %v107_v39  ;;  %v136_v40 = vld [vmem:[%s135_s24] sm:$0x1]  ;;  %s193_s15 = scalar_lea.vmem %s735_s3, %s668_s23  ;;  %s453_s6 = sld [smem:[#allocation6 + $0x23]] }
  0x45   :  { %137 = vst [vmem:[#allocation3 + $0x1b] sm:$0x1] %v136_v40  ;;  %v165_v41 = vld [vmem:[%s164_s30] sm:$0x1]  ;;  %s222_s19 = scalar_lea.vmem %s735_s3, %s470_s2  ;;  %s459_s8 = sld [smem:[#allocation6 + $0x24]] }
  0x46   :  { %166 = vst [vmem:[#allocation3 + $0x1c] sm:$0x1] %v165_v41  ;;  %v194_v42 = vld [vmem:[%s193_s15] sm:$0x1]  ;;  %s251_s12 = scalar_lea.vmem %s735_s3, %s476_s18  ;;  %s465_s25 = sld [smem:[#allocation6 + $0x25]] }
  0x47   :  { %195 = vst [vmem:[#allocation3 + $0x1d] sm:$0x1] %v194_v42  ;;  %v223_v43 = vld [vmem:[%s222_s19] sm:$0x1]  ;;  %s52_s16 = scalar_lea.vmem %s735_s3, %s682_s26  ;;  %s471_s1 = sld [smem:[#allocation6 + $0x26]] }
  0x48   :  { %v261_v44 = vld [vmem:[#allocation3 + $0x8] sm:$0xff]  ;;  %224 = vst [vmem:[#allocation3 + $0x1e] sm:$0x1] %v223_v43  ;;  %v252_v45 = vld [vmem:[%s251_s12] sm:$0x1]  ;;  %s82_s22 = scalar_lea.vmem %s735_s3, %s441_s27  ;;  %s477_s0 = sld [smem:[#allocation6 + $0x27]] }
  0x49   :  { %v266_v46 = vmul.f32 %v261_v44, %v622_v22  ;;  %253 = vst [vmem:[#allocation3 + $0x1f] sm:$0x1] %v252_v45  ;;  %v53_v47 = vld [vmem:[%s52_s16] sm:$0x1]  ;;  %s111_s24 = scalar_lea.vmem %s735_s3, %s447_s28 }
  0x4a   :  { %55 = vst [vmem:[#allocation3 + $0x20] sm:$0x1] %v53_v47  ;;  %v83_v48 = vld [vmem:[%s82_s22] sm:$0x1]  ;;  %s140_s13 = scalar_lea.vmem %s735_s3, %s453_s6 }
  0x4b   :  { %272 = vadd.xlane.f32.xlu0 %v266_v46  ;;  %84 = vst [vmem:[#allocation3 + $0x21] sm:$0x1] %v83_v48  ;;  %v112_v49 = vld [vmem:[%s111_s24] sm:$0x1]  ;;  %s169_s27 = scalar_lea.vmem %s735_s3, %s459_s8 }
  0x4c   :  { %113 = vst [vmem:[#allocation3 + $0x22] sm:$0x1] %v112_v49  ;;  %v141_v50 = vld [vmem:[%s140_s13] sm:$0x1]  ;;  %s198_s21 = scalar_lea.vmem %s735_s3, %s465_s25 }
  0x4d   :  { %142 = vst [vmem:[#allocation3 + $0x23] sm:$0x1] %v141_v50  ;;  %v170_v51 = vld [vmem:[%s169_s27] sm:$0x1]  ;;  %s227_s19 = scalar_lea.vmem %s735_s3, %s471_s1 }
  0x4e   :  { %171 = vst [vmem:[#allocation3 + $0x24] sm:$0x1] %v170_v51  ;;  %v199_v52 = vld [vmem:[%s198_s21] sm:$0x1]  ;;  %s256_s10 = scalar_lea.vmem %s735_s3, %s477_s0 }
  0x4f   :  { %200 = vst [vmem:[#allocation3 + $0x25] sm:$0x1] %v199_v52  ;;  %v228_v53 = vld [vmem:[%s227_s19] sm:$0x1] }
  0x50   :  { %v263_v54 = vld [vmem:[#allocation3 + $0x18] sm:$0xff]  ;;  %229 = vst [vmem:[#allocation3 + $0x26] sm:$0x1] %v228_v53 }
  0x51   :  { %v257_v55 = vld [vmem:[%s256_s10] sm:$0x1]  ;;  %v268_v56 = vmul.f32 %v263_v54, %v622_v22 }
  0x52   :  { %258 = vst [vmem:[#allocation3 + $0x27] sm:$0x1] %v257_v55 }
  0x53   :  { %276 = vadd.xlane.f32.xlu1 %v268_v56 }
  0x59   :  { %v264_v57 = vld [vmem:[#allocation3 + $0x20] sm:$0xff] }
  0x5a   :  { %v269_v58 = vmul.f32 %v264_v57, %v622_v22 }
  0x5c   :  { %278 = vadd.xlane.f32.xlu0 %v269_v58 }
  0xc3   :  { %v271_v59 = vpop.xlane.xlu0 %270 }
  0xc4   :  { %v283_v3 = vsub.f32 0.0, %v271_v59  ;;  %v298_v8 = vrot.slane %v271_v59, %v297_v2 }
  0xc6   :  { %v332_v9 = vrot.slane %v283_v3, %v297_v2 }
  0xcc   :  { %v275_v0 = vpop.xlane.xlu1 %274 }
  0xcd   :  { %v285_v7 = vsub.f32 0.0, %v275_v0  ;;  %v306_v13 = vrot.slane %v275_v0, %v297_v2 }
  0xcf   :  { %v340_v14 = vrot.slane %v285_v7, %v297_v2 }
  0xd4   :  { %v273_v61 = vpop.xlane.xlu0 %272 }
  0xd5   :  { %v284_v1 = vsub.f32 0.0, %v273_v61  ;;  %v302_v4 = vrot.slane %v273_v61, %v297_v2 }
  0xd7   :  { %v336_v5 = vrot.slane %v284_v1, %v297_v2  ;;  %v316_v11 = vsel %vm315_vm0, %v302_v4, %v298_v8 }
  0xd8   :  { %v318_v17 = vsel %vm317_vm1, %v306_v13, %v316_v11 }
  0xd9   :  { %v349_v12 = vsel %vm315_vm0, %v336_v5, %v332_v9 }
  0xda   :  { %v350_v18 = vsel %vm317_vm1, %v340_v14, %v349_v12 }
  0xdc   :  { %v277_v6 = vpop.xlane.xlu1 %276 }
  0xdd   :  { %v286_v10 = vsub.f32 0.0, %v277_v6  ;;  %v310_v15 = vrot.slane %v277_v6, %v297_v2 }
  0xdf   :  { %v344_v16 = vrot.slane %v286_v10, %v297_v2  ;;  %v320_v22 = vsel %vm319_vm2, %v310_v15, %v318_v17 }
  0xe1   :  { %v351_v23 = vsel %vm319_vm2, %v344_v16, %v350_v18 }
  0xe5   :  { %v279_v19 = vpop.xlane.xlu0 %278 }
  0xe6   :  { %v287_v20 = vsub.f32 0.0, %v279_v19  ;;  %v314_v21 = vrot.slane %v279_v19, %v297_v2 }
  0xe8   :  { %v348_v24 = vrot.slane %v287_v20, %v297_v2  ;;  %v322_v25 = vsel %vm321_vm3, %v314_v21, %v320_v22 }
  0xea   :  { %v352_v26 = vsel %vm321_vm3, %v348_v24, %v351_v23 }
  0xeb   :  { %v354_v27 = vsel %vm282_vm4, %v322_v25, %v352_v26 }
  0xec   :  { %v356_v28 = vand.u32 2147483647, %v354_v27  ;;  %v355_v39 = vmin.f32 %v354_v27, 0.0 }
  0xee   :  { %v357_v29 = vsub.f32 0.0, %v356_v28 }
  0xf0   :  { %v358_v30 = vmul.f32 1.442695, %v357_v29 }
  0xf2   :  { %480 = vpow2.f32 %v358_v30 }
  0xff   :  { %v481_v31 = vpop.eup %480 }
 0x100   :  { %v360_v32 = vadd.f32 1.0, %v481_v31  ;;  %v363_v33 = vmul.f32 -0.5, %v481_v31  ;;  %v366_v35 = vand.u32 2147483647, %v481_v31 }
 0x102   :  { %482 = vlog2.f32 %v360_v32  ;;  %v364_v34 = vadd.f32 1.0, %v363_v33  ;;  %vm367_vm5 = vcmp.lt.f32.partialorder %v366_v35, 0.0004427343 }
 0x104   :  { %v365_v38 = vmul.f32 %v481_v31, %v364_v34 }
 0x10f   :  { %v483_v36 = vpop.eup %482 }
 0x110   :  { %v362_v37 = vmul.f32 0.6931472, %v483_v36 }
 0x112   :  { %v368_v40 = vsel %vm367_vm5, %v365_v38, %v362_v37 }
 0x113   :  { %v369_v41 = vsub.f32 %v355_v39, %v368_v40 }
 0x115   :  { %v371_v42 = vsel %vm370_vm6, %v369_v41, 0.0 }
 0x116   :  { %v372_v43 = vrot.slane %v371_v42, 4 }
 0x118   :  { %v373_v44 = vadd.f32 %v372_v43, %v371_v42 }
 0x11a   :  { %v374_v45 = vrot.slane %v373_v44, 2 }
 0x11c   :  { %v375_v46 = vadd.f32 %v374_v45, %v373_v44 }
 0x11e   :  { %v376_v47 = vrot.slane %v375_v46, 1 }
 0x120   :  { %v377_v48 = vadd.f32 %v376_v47, %v375_v46 }
 0x122   :  { %379 = vst.msk [vmem:[%s736_s4] sm:$0x1] %vm378_vm7, %v377_v48 }

</bundles_post_ra>
